<compile_context>
chip_gen: v5e
topology: v5e:2x2
jax: 0.10.0
libtpu: 0.0.40
codegen_flags: <defaults>
</compile_context>

<pallas_src>
import jax
import jax.numpy as jnp
from jax.experimental import pallas as pl
from jax.experimental.pallas import tpu as pltpu


def _mlp_softmax_kernel(x_ref, w1_ref, b1_ref, w2_ref, b2_ref, w3_ref, b3_ref,
                        o_ref):
    x = x_ref[...]                                               # (TB, 39) f32

    # MXU-friendly: cast activations to the (bf16) weight dtype right before
    # each dot, accumulate in f32, keep all elementwise math in f32.
    h1 = jnp.dot(x.astype(w1_ref.dtype), w1_ref[...],
                 preferred_element_type=jnp.float32)
    h1 = jnp.maximum(h1 + b1_ref[...], 0.0)                      # (TB, 64)

    h2 = jnp.dot(h1.astype(w2_ref.dtype), w2_ref[...],
                 preferred_element_type=jnp.float32)
    h2 = jnp.maximum(h2 + b2_ref[...], 0.0)                      # (TB, 64)

    logits = jnp.dot(h2.astype(w3_ref.dtype), w3_ref[...],
                     preferred_element_type=jnp.float32)
    logits = logits + b3_ref[...]                                # (TB, 3)

    # Numerically-stable softmax with EXACT normalization (rows sum to 1 to
    # f32 precision).
    m = jnp.max(logits, axis=-1, keepdims=True)
    e = jnp.exp(logits - m)
    o_ref[...] = e / jnp.sum(e, axis=-1, keepdims=True)


def _round_up(n, m):
    return ((n + m - 1) // m) * m


def _cdiv(n, m):
    return (n + m - 1) // m


def xor_model_forward(x, params, *, max_tile=4096, min_pallas_batch=256,
                      use_bf16=True):
    """x: (B, 3, 13) or (B, 39) float32. Returns (B, 3) softmax probabilities."""
    w1, b1, w2, b2, w3, b3 = params
    x2d = x.reshape(-1, 3 * 13).astype(jnp.float32)              # x.view(-1, 39)
    B = x2d.shape[0]

    if B < min_pallas_batch:
        # Tiny batches are pure launch/DMA-setup overhead for a kernel; a fused
        # XLA matmul chain wins. Exact f32 semantics.
        h1 = jnp.maximum(x2d @ w1 + b1, 0.0)
        h2 = jnp.maximum(h1 @ w2 + b2, 0.0)
        return jax.nn.softmax(h2 @ w3 + b3, axis=-1)

    wdt = jnp.bfloat16 if use_bf16 else jnp.float32
    w1c, w2c, w3c = (w.astype(wdt) for w in (w1, w2, w3))

    # Batch tile: large (amortize ~0.35us/step overhead), multiple of 16 (bf16
    # sublane packing). For large B split into >=2 tiles so the "parallel"
    # batch axis can shard across v7x's two TensorCores.
    want_tiles = 2 if B >= 1024 else 1
    TB = min(max_tile, _round_up(_cdiv(B, want_tiles), 16))
    Bp = _round_up(B, TB)
    if Bp != B:
        x2d = jnp.pad(x2d, ((0, Bp - B), (0, 0)))                # zero-pad rows

    grid = (Bp // TB,)

    # Weights / biases: constant index map -> fetched once, VMEM-resident.
    const = lambda shape: pl.BlockSpec(shape, lambda i: (0, 0))

    out = pl.pallas_call(
        _mlp_softmax_kernel,
        out_shape=jax.ShapeDtypeStruct((Bp, 3), jnp.float32),
        grid=grid,
        in_specs=[
            pl.BlockSpec((TB, 39), lambda i: (i, 0)),            # batch-tiled input
            const((39, 64)), const((1, 64)),
            const((64, 64)), const((1, 64)),
            const((64, 3)),  const((1, 3)),
        ],
        out_specs=pl.BlockSpec((TB, 3), lambda i: (i, 0)),
        compiler_params=pltpu.CompilerParams(
            dimension_semantics=("parallel",),   # batch axis; shards TCs on v7x
            vmem_limit_bytes=32 << 20,           # lane-padded tiles + dbl-buffer
        ),
    )(x2d, w1c, b1, w2c, b2, w3c, b3)

    return out[:B] if Bp != B else out


def init_params(key):
    """Deterministic init mirroring nn.Linear's U(-1/sqrt(fan_in), 1/sqrt(fan_in)).
    Weights are returned already transposed to (in, out) for the kernel."""
    def linear(key, fan_in, fan_out):
        kw, kb = jax.random.split(key)
        bound = 1.0 / jnp.sqrt(fan_in)
        w = jax.random.uniform(kw, (fan_out, fan_in), jnp.float32, -bound, bound)
        b = jax.random.uniform(kb, (1, fan_out), jnp.float32, -bound, bound)
        return w.T, b

    k1, k2, k3 = jax.random.split(key, 3)
    w1, b1 = linear(k1, 39, 64)
    w2, b2 = linear(k2, 64, 64)
    w3, b3 = linear(k3, 64, 3)
    return (w1, b1, w2, b2, w3, b3)


def _reference(x, params):
    w1, b1, w2, b2, w3, b3 = params
    xf = x.reshape(-1, 39).astype(jnp.float32)
    h1 = jnp.maximum(xf @ w1 + b1, 0.0)
    h2 = jnp.maximum(h1 @ w2 + b2, 0.0)
    return jax.nn.softmax(h2 @ w3 + b3, axis=-1)


if __name__ == "__main__":
    key = jax.random.PRNGKey(0)
    kx, kx2, kp = jax.random.split(key, 3)
    params = init_params(kp)

    # Small case consistent with x.view(-1, 3*13): batch=8, shape (8, 3, 13).
    x = jax.random.normal(kx, (8, 3, 13), dtype=jnp.float32)
    ref = _reference(x, params)

    # Force the Pallas kernel path even at tiny B (single padded 16-row tile).
    out = jax.block_until_ready(xor_model_forward(x, params, min_pallas_batch=0))
    assert out.shape == (8, 3)
    assert jnp.allclose(out, ref, atol=2e-2, rtol=2e-2)          # bf16 MXU operands
    assert jnp.allclose(jnp.sum(out, axis=1), 1.0, atol=1e-5)    # exact normalization

    # Default dispatch for tiny B takes the fused-XLA fast path (exact f32).
    out_fast = jax.block_until_ready(xor_model_forward(x, params))
    assert jnp.allclose(out_fast, ref, atol=1e-5, rtol=1e-5)

    # Multi-step, padded path: B=600 with a 256-row tile -> 3 grid steps.
    x_big = jax.random.normal(kx2, (600, 3, 13), dtype=jnp.float32)
    out_big = jax.block_until_ready(
        xor_model_forward(x_big, params, max_tile=256, min_pallas_batch=0))
    ref_big = _reference(x_big, params)
    assert out_big.shape == (600, 3)
    assert jnp.allclose(out_big, ref_big, atol=2e-2, rtol=2e-2)
    assert jnp.allclose(jnp.sum(out_big, axis=1), 1.0, atol=1e-5)

    print("KERNEL_OK")
</pallas_src>

<mosaic_0001>
module attributes {stable_mosaic.version = 11 : i64} {
  func.func @_mlp_softmax_kernel(%arg0: i32, %arg1: memref<16x39xf32, #tpu.memory_space<vmem>>, %arg2: memref<39x64xbf16, #tpu.memory_space<vmem>>, %arg3: memref<1x64xf32, #tpu.memory_space<vmem>>, %arg4: memref<64x64xbf16, #tpu.memory_space<vmem>>, %arg5: memref<1x64xf32, #tpu.memory_space<vmem>>, %arg6: memref<64x3xbf16, #tpu.memory_space<vmem>>, %arg7: memref<1x3xf32, #tpu.memory_space<vmem>>, %arg8: memref<16x3xf32, #tpu.memory_space<vmem>>) attributes {dimension_semantics = [#tpu.dimension_semantics<parallel>], iteration_bounds = array<i64: 1>, scalar_prefetch = 0 : i64, scratch_operands = 0 : i64, tpu.core_type = #tpu.core_type<tc>, window_params = [{transform_indices = @transform_0, window_bounds = array<i64: 16, 39>}, {pipeline_mode = #tpu.pipeline_mode<synchronous>, transform_indices = @transform_1, window_bounds = array<i64: 39, 64>}, {pipeline_mode = #tpu.pipeline_mode<synchronous>, transform_indices = @transform_2, window_bounds = array<i64: 1, 64>}, {pipeline_mode = #tpu.pipeline_mode<synchronous>, transform_indices = @transform_3, window_bounds = array<i64: 64, 64>}, {pipeline_mode = #tpu.pipeline_mode<synchronous>, transform_indices = @transform_4, window_bounds = array<i64: 1, 64>}, {pipeline_mode = #tpu.pipeline_mode<synchronous>, transform_indices = @transform_5, window_bounds = array<i64: 64, 3>}, {pipeline_mode = #tpu.pipeline_mode<synchronous>, transform_indices = @transform_6, window_bounds = array<i64: 1, 3>}, {transform_indices = @transform_7, window_bounds = array<i64: 16, 3>}]} {
    %c0 = arith.constant 0 : index
    %c0_0 = arith.constant 0 : index
    %0 = vector.load %arg1[%c0, %c0_0] : memref<16x39xf32, #tpu.memory_space<vmem>>, vector<16x39xf32>
    %1 = arith.truncf %0 : vector<16x39xf32> to vector<16x39xbf16>
    %c0_1 = arith.constant 0 : index
    %c0_2 = arith.constant 0 : index
    %2 = vector.load %arg2[%c0_1, %c0_2] : memref<39x64xbf16, #tpu.memory_space<vmem>>, vector<39x64xbf16>
    %cst = arith.constant dense<0.000000e+00> : vector<16x64xf32>
    %3 = tpu.matmul %1, %2, %cst {dimension_numbers = #tpu.dot_dimension_numbers<[1], [0], [0], [1], [0, 0, 1, 1], [], []>} : vector<16x39xbf16>, vector<39x64xbf16>, vector<16x64xf32> -> vector<16x64xf32>
    %c0_3 = arith.constant 0 : index
    %c0_4 = arith.constant 0 : index
    %4 = vector.load %arg3[%c0_3, %c0_4] : memref<1x64xf32, #tpu.memory_space<vmem>>, vector<1x64xf32>
    %5 = vector.broadcast %4 : vector<1x64xf32> to vector<16x64xf32>
    %6 = arith.addf %3, %5 : vector<16x64xf32>
    %cst_5 = arith.constant 0.000000e+00 : f32
    %7 = vector.broadcast %cst_5 : f32 to vector<16x64xf32>
    %8 = arith.maximumf %6, %7 : vector<16x64xf32>
    %9 = arith.truncf %8 : vector<16x64xf32> to vector<16x64xbf16>
    %c0_6 = arith.constant 0 : index
    %c0_7 = arith.constant 0 : index
    %10 = vector.load %arg4[%c0_6, %c0_7] : memref<64x64xbf16, #tpu.memory_space<vmem>>, vector<64x64xbf16>
    %cst_8 = arith.constant dense<0.000000e+00> : vector<16x64xf32>
    %11 = tpu.matmul %9, %10, %cst_8 {dimension_numbers = #tpu.dot_dimension_numbers<[1], [0], [0], [1], [0, 0, 1, 1], [], []>} : vector<16x64xbf16>, vector<64x64xbf16>, vector<16x64xf32> -> vector<16x64xf32>
    %c0_9 = arith.constant 0 : index
    %c0_10 = arith.constant 0 : index
    %12 = vector.load %arg5[%c0_9, %c0_10] : memref<1x64xf32, #tpu.memory_space<vmem>>, vector<1x64xf32>
    %13 = vector.broadcast %12 : vector<1x64xf32> to vector<16x64xf32>
    %14 = arith.addf %11, %13 : vector<16x64xf32>
    %cst_11 = arith.constant 0.000000e+00 : f32
    %15 = vector.broadcast %cst_11 : f32 to vector<16x64xf32>
    %16 = arith.maximumf %14, %15 : vector<16x64xf32>
    %17 = arith.truncf %16 : vector<16x64xf32> to vector<16x64xbf16>
    %c0_12 = arith.constant 0 : index
    %c0_13 = arith.constant 0 : index
    %18 = vector.load %arg6[%c0_12, %c0_13] : memref<64x3xbf16, #tpu.memory_space<vmem>>, vector<64x3xbf16>
    %cst_14 = arith.constant dense<0.000000e+00> : vector<16x3xf32>
    %19 = tpu.matmul %17, %18, %cst_14 {dimension_numbers = #tpu.dot_dimension_numbers<[1], [0], [0], [1], [0, 0, 1, 1], [], []>} : vector<16x64xbf16>, vector<64x3xbf16>, vector<16x3xf32> -> vector<16x3xf32>
    %c0_15 = arith.constant 0 : index
    %c0_16 = arith.constant 0 : index
    %20 = vector.load %arg7[%c0_15, %c0_16] : memref<1x3xf32, #tpu.memory_space<vmem>>, vector<1x3xf32>
    %21 = vector.broadcast %20 : vector<1x3xf32> to vector<16x3xf32>
    %22 = arith.addf %19, %21 : vector<16x3xf32>
    %cst_17 = arith.constant dense<0xFF800000> : vector<16xf32>
    %23 = vector.multi_reduction <maximumf>, %22, %cst_17 [1] : vector<16x3xf32> to vector<16xf32>
    %24 = vector.shape_cast %23 : vector<16xf32> to vector<16x1xf32>
    %25 = vector.broadcast %24 : vector<16x1xf32> to vector<16x3xf32>
    %26 = arith.subf %22, %25 : vector<16x3xf32>
    %27 = math.exp %26 : vector<16x3xf32>
    %cst_18 = arith.constant dense<0.000000e+00> : vector<16xf32>
    %28 = vector.multi_reduction <add>, %27, %cst_18 [1] : vector<16x3xf32> to vector<16xf32>
    %29 = vector.shape_cast %28 : vector<16xf32> to vector<16x1xf32>
    %30 = vector.broadcast %29 : vector<16x1xf32> to vector<16x3xf32>
    %31 = arith.divf %27, %30 : vector<16x3xf32>
    %c0_19 = arith.constant 0 : index
    %c0_20 = arith.constant 0 : index
    %32 = vector.load %arg8[%c0_19, %c0_20] : memref<16x3xf32, #tpu.memory_space<vmem>>, vector<16x3xf32>
    tpu.vector_store %arg8[%c0_19, %c0_20], %31 {strides = array<i32>} : memref<16x3xf32, #tpu.memory_space<vmem>>, vector<16x3xf32>,
    return
  }
  func.func @transform_0(%arg0: i32) -> (i32, i32) {
    %c0_i32 = arith.constant 0 : i32
    %c0_i32_0 = arith.constant 0 : i32
    return %arg0, %c0_i32 : i32, i32
  }
  func.func @transform_1(%arg0: i32) -> (i32, i32) {
    %c0_i32 = arith.constant 0 : i32
    %c0_i32_0 = arith.constant 0 : i32
    %c0_i32_1 = arith.constant 0 : i32
    return %c0_i32, %c0_i32_0 : i32, i32
  }
  func.func @transform_2(%arg0: i32) -> (i32, i32) {
    %c0_i32 = arith.constant 0 : i32
    %c0_i32_0 = arith.constant 0 : i32
    %c0_i32_1 = arith.constant 0 : i32
    return %c0_i32, %c0_i32_0 : i32, i32
  }
  func.func @transform_3(%arg0: i32) -> (i32, i32) {
    %c0_i32 = arith.constant 0 : i32
    %c0_i32_0 = arith.constant 0 : i32
    %c0_i32_1 = arith.constant 0 : i32
    return %c0_i32, %c0_i32_0 : i32, i32
  }
  func.func @transform_4(%arg0: i32) -> (i32, i32) {
    %c0_i32 = arith.constant 0 : i32
    %c0_i32_0 = arith.constant 0 : i32
    %c0_i32_1 = arith.constant 0 : i32
    return %c0_i32, %c0_i32_0 : i32, i32
  }
  func.func @transform_5(%arg0: i32) -> (i32, i32) {
    %c0_i32 = arith.constant 0 : i32
    %c0_i32_0 = arith.constant 0 : i32
    %c0_i32_1 = arith.constant 0 : i32
    return %c0_i32, %c0_i32_0 : i32, i32
  }
  func.func @transform_6(%arg0: i32) -> (i32, i32) {
    %c0_i32 = arith.constant 0 : i32
    %c0_i32_0 = arith.constant 0 : i32
    %c0_i32_1 = arith.constant 0 : i32
    return %c0_i32, %c0_i32_0 : i32, i32
  }
  func.func @transform_7(%arg0: i32) -> (i32, i32) {
    %c0_i32 = arith.constant 0 : i32
    %c0_i32_0 = arith.constant 0 : i32
    return %arg0, %c0_i32 : i32, i32
  }
}

</mosaic_0001>

<bundles_post_ra>
// kernel: tpu_custom_call.1
= control target key start
LH: loop header
LB: loop body
LE: loop exit
PB: predicated region body
PF: predicated region fallthrough
CT: control target
= control target key end

     0   :  { %12 = vsyncpa [#allocation3], 0  ;;  %s504_s0 = inlined_call_operand.hbm [shape: f32[16,39], index: 0, kind: input, shape index: {}]   ;;  %s505_s1 = inlined_call_operand.hbm [shape: bf16[39,64], index: 1, kind: input, shape index: {}]   ;;  %s506_s2 = inlined_call_operand.vmem [shape: f32[1,64], index: 2, kind: input, shape index: {}]   ;;  %s507_s3 = inlined_call_operand.vmem [shape: bf16[64,64], index: 3, kind: input, shape index: {}]   ;;  %s508_s4 = inlined_call_operand.vmem [shape: f32[1,64], index: 4, kind: input, shape index: {}]   ;;  %s509_s5 = inlined_call_operand.vmem [shape: bf16[64,3], index: 5, kind: input, shape index: {}]   ;;  %s510_s6 = inlined_call_operand.vmem [shape: f32[1,3], index: 6, kind: input, shape index: {}]   ;;  %s511_s7 = inlined_call_operand.vmem [shape: f32[16,3], index: 7, kind: output, shape index: {}]  }
   0x1   :  { %s18_s26 = sshll.u32 %s504_s0, 4  ;;  %s19_s26 = int_to_ptr.hbm [resolvable:$true] %s18_s26 }
   0x2   :  { %13 = vsyncpa [#allocation5], 0  ;;  %s404_s27 = smov [#allocation2]   ;;  %s31_s8 = sshll.u32 %s505_s1, 4  ;;  %s32_s8 = int_to_ptr.hbm [resolvable:$true] %s31_s8 }
   0x3   :  { %s20_s28 = sshll.u32 %s404_s27, 4  ;;  %s405_s9 = smov 128   ;;  %s21_s28 = int_to_ptr.vmem [resolvable:$true] %s20_s28 }
   0x4   :  { %s406_s10 = smov 8   ;;  %s407_s11 = smov [#allocation4]  }
   0x5   :  { %26 = dma.hbm_to_vmem [thread:$0]  %s19_s26, 256, %s21_s28, [#allocation3], %s405_s9, %s405_s9, %s406_s10  }
   0x6   :  { %s33_s12 = sshll.u32 %s407_s11, 4  ;;  %s408_s13 = smov 64   ;;  %s34_s12 = int_to_ptr.vmem [resolvable:$true] %s33_s12 }
   0x7   :  { %s409_s14 = smov 4  }
   0x8   :  { %39 = dma.hbm_to_vmem [thread:$0]  %s32_s8, 320, %s34_s12, [#allocation5], %s408_s13, %s408_s13, %s409_s14  }
   0x9   :  { %400 = dma.done.wait [#allocation3], 256  }
   0xa   :  { %401 = vsyncadd [#allocation3], 4294967040 }
   0xb   :  { %402 = dma.done.wait [#allocation5], 320  }
   0xc   :  { %403 = vsyncadd [#allocation5], 4294966976  ;;  %vm90_vm0 = vcmask 1042432   ;;  %vm91_vm1 = vcmask 1043456   ;;  %v410_v0 = vmov 65535   ;;  %v325_v7 = vld [vmem:[#allocation4 + $0x8] sm:$0xff] }
   0xd   :  { %v92_v1 = vsel %vm90_vm0, 4294967295, %v410_v0  ;;  %v66_v2 = vld [vmem:[#allocation4 + $0x10] sm:$0xf]  ;;  %v324_v8 = vld [vmem:[#allocation4] sm:$0xff]  ;;  %v60_v10 = vld [vmem:[#allocation2 + $0x8] sm:$0xff]  ;;  %vm86_vm2 = vcmask 318464  }
   0xe   :  { %v80_v3 = vunpack.c.l.b16 %v66_v2  ;;  %v93_v4 = vsel %vm91_vm1, %v92_v1, 0  ;;  %v59_v9 = vld [vmem:[#allocation2] sm:$0xff]  ;;  %v329_v12 = vld [vmem:[%s507_s3 + $0x18] sm:$0xff]  ;;  %v328_v13 = vld [vmem:[%s507_s3 + $0x10] sm:$0xff]  ;;  %vm150_vm3 = vcmask 523264   ;;  %vm224_vm4 = vcmask 23552  }
   0xf   :  { %v61_v11 = vpack.c.bf16 %v60_v10, %v59_v9  ;;  %158 = vmatpush.bf16.msra.mxu1 %v329_v12  ;;  %v327_v14 = vld [vmem:[%s507_s3 + $0x8] sm:$0xff]  ;;  %v326_v15 = vld [vmem:[%s507_s3] sm:$0xff]  ;;  %v333_v24 = vld [vmem:[%s509_s5 + $0x18] sm:$0xff] }
  0x10   :  { %v83_v5 = vpack.c.b16 %v80_v3, %v80_v3  ;;  %v341_v17 = vld [vmem:[%s506_s2] ss:$0 sm:$0xff]  ;;  %214 = vmatpush.bf16.msra.mxu2 %v333_v24  ;;  %v332_v25 = vld [vmem:[%s509_s5 + $0x10] sm:$0xff]  ;;  %v331_v26 = vld [vmem:[%s509_s5 + $0x8] sm:$0xff] }
  0x11   :  { %v330_v27 = vld [vmem:[%s509_s5] sm:$0xff] }
  0x12   :  { %v95_v6 = vand.u32 %v93_v4, %v83_v5  ;;  %v342_v29 = vld [vmem:[%s508_s4] ss:$0 sm:$0xff] }
  0x13   :  { %159 = vmatpush.bf16.msra.mxu1 %v328_v13  ;;  %v343_v36 = vld [vmem:[%s510_s6] ss:$0 sm:$0xff] }
  0x14   :  { %102 = vmatpush.bf16.msra.mxu0 %v95_v6  ;;  %215 = vmatpush.bf16.msra.mxu2 %v332_v25 }
  0x17   :  { %160 = vmatpush.bf16.msra.mxu1 %v327_v14 }
  0x18   :  { %103 = vmatpush.bf16.msra.mxu0 %v325_v7  ;;  %216 = vmatpush.bf16.msra.mxu2 %v331_v26 }
  0x1b   :  { %161 = vmatpush.bf16.msra.mxu1 %v326_v15 }
  0x1c   :  { %104 = vmatpush.bf16.msra.mxu0 %v324_v8  ;;  %217 = vmatpush.bf16.msra.mxu2 %v330_v27 }
  0x1f   :  { %289 = vmatmul.msk.bf16.vlgmr.msra.gmra.mxu0 %vm86_vm2, %v61_v11 }
  0x9c   :  { %v106_v16 = vpop.f32.mrf.mxu0 }
  0x9d   :  { %v107_v18 = vadd.f32 %v341_v17, %v106_v16 }
  0x9f   :  { %v111_v21 = vmax.f32 %v107_v18, 0.0 }
  0xa4   :  { %v108_v19 = vpop.f32.mrf.mxu0 }
  0xa5   :  { %v109_v20 = vadd.f32 %v341_v17, %v108_v19 }
  0xa7   :  { %v112_v22 = vmax.f32 %v109_v20, 0.0 }
  0xa9   :  { %v113_v23 = vpack.c.bf16 %v112_v22, %v111_v21 }
  0xab   :  { %306 = vmatmul.msk.bf16.vlgmr.msra.gmra.mxu1 %vm150_vm3, %v113_v23 }
 0x128   :  { %v163_v28 = vpop.f32.mrf.mxu1 }
 0x129   :  { %v164_v30 = vadd.f32 %v342_v29, %v163_v28 }
 0x12b   :  { %v168_v33 = vmax.f32 %v164_v30, 0.0 }
 0x130   :  { %v165_v31 = vpop.f32.mrf.mxu1 }
 0x131   :  { %v166_v32 = vadd.f32 %v342_v29, %v165_v31 }
 0x133   :  { %v169_v34 = vmax.f32 %v166_v32, 0.0 }
 0x135   :  { %v170_v35 = vpack.c.bf16 %v169_v34, %v168_v33 }
 0x137   :  { %323 = vmatmul.msk.bf16.vlgmr.msra.gmra.mxu2 %vm150_vm3, %v170_v35 }
 0x1ba   :  { %v219_v37 = vpop.f32.mrf.mxu2 }
 0x1bb   :  { %v220_v38 = vadd.f32 %v343_v36, %v219_v37 }
 0x1bd   :  { %v225_v39 = vsel %vm224_vm4, %v220_v38, -inf }
 0x1be   :  { %226 = vmax.xlane.f32.xlu0 %v225_v39 }
 0x1c2   :  { %v221_v40 = vpop.f32.mrf.mxu2 }
 0x1c3   :  { %v222_v41 = vadd.f32 %v343_v36, %v221_v40 }
 0x1c5   :  { %v228_v42 = vsel %vm224_vm4, %v222_v41, -inf }
 0x1c6   :  { %229 = vmax.xlane.f32.xlu0 %v228_v42 }
 0x231   :  { %v227_v43 = vpop.xlane.xlu0 %226 }
 0x232   :  { %v231_v44 = vsub.f32 %v220_v38, %v227_v43 }
 0x234   :  { %v233_v45 = vmul.f32 1.442695, %v231_v44 }
 0x236   :  { %344 = vpow2.f32 %v233_v45 }
 0x239   :  { %v230_v46 = vpop.xlane.xlu0 %229 }
 0x23a   :  { %v232_v47 = vsub.f32 %v222_v41, %v230_v46 }
 0x23c   :  { %v345_v48 = vpop.eup %344  ;;  %v235_v49 = vmul.f32 1.442695, %v232_v47 }
 0x23d   :  { %v237_v50 = vsel %vm224_vm4, %v345_v48, 0.0 }
 0x23e   :  { %346 = vpow2.f32 %v235_v49  ;;  %238 = vadd.xlane.f32.xlu1 %v237_v50 }
 0x244   :  { %v347_v51 = vpop.eup %346 }
 0x245   :  { %v240_v52 = vsel %vm224_vm4, %v347_v51, 0.0 }
 0x246   :  { %241 = vadd.xlane.f32.xlu1 %v240_v52 }
 0x2b1   :  { %v239_v53 = vpop.xlane.xlu1 %238 }
 0x2b2   :  { %348 = vrcp.f32 %v239_v53  ;;  %v254_v58 = vand.u32 2147483648, %v239_v53  ;;  %v252_v60 = vand.u32 2147483647, %v239_v53  ;;  %vm248_vm6 = vweird.f32 %v239_v53 }
 0x2b4   :  { %v255_v63 = vor.u32 1.1754944e-38, %v254_v58  ;;  %vm253_vm8 = vcmp.eq.f32.partialorder %v252_v60, 8.507059e+37 }
 0x2b8   :  { %v349_v54 = vpop.eup %348 }
 0x2b9   :  { %v244_v55 = vmul.f32 %v349_v54, %v239_v53  ;;  %v242_v56 = vpop.xlane.xlu1 %241  ;;  %vm249_vm5 = vweird.f32 %v349_v54 }
 0x2ba   :  { %350 = vrcp.f32 %v242_v56  ;;  %vm250_vm7 = vmor %vm248_vm6, %vm249_vm5  ;;  %v269_v5 = vand.u32 2147483648, %v242_v56  ;;  %v267_v7 = vand.u32 2147483647, %v242_v56  ;;  %vm263_vm10 = vweird.f32 %v242_v56 }
 0x2bb   :  { %v245_v57 = vsub.f32 1.0, %v244_v55 }
 0x2bc   :  { %v270_v9 = vor.u32 1.1754944e-38, %v269_v5  ;;  %vm268_vm12 = vcmp.eq.f32.partialorder %v267_v7, 8.507059e+37 }
 0x2bd   :  { %v246_v59 = vmul.f32 %v349_v54, %v245_v57 }
 0x2bf   :  { %v247_v61 = vadd.f32 %v349_v54, %v246_v59 }
 0x2c0   :  { %v351_v62 = vpop.eup %350 }
 0x2c1   :  { %v251_v0 = vsel %vm250_vm7, %v349_v54, %v247_v61  ;;  %v259_v1 = vmul.f32 %v351_v62, %v242_v56  ;;  %vm264_vm9 = vweird.f32 %v351_v62 }
 0x2c2   :  { %v256_v2 = vsel %vm253_vm8, %v255_v63, %v251_v0  ;;  %vm265_vm11 = vmor %vm263_vm10, %vm264_vm9 }
 0x2c3   :  { %v257_v3 = vmul.f32 %v345_v48, %v256_v2  ;;  %v260_v4 = vsub.f32 1.0, %v259_v1 }
 0x2c5   :  { %273 = vst.msk [vmem:[%s511_s7] sm:$0xff] %vm224_vm4, %v257_v3  ;;  %v261_v6 = vmul.f32 %v351_v62, %v260_v4 }
 0x2c7   :  { %v262_v8 = vadd.f32 %v351_v62, %v261_v6 }
 0x2c9   :  { %v266_v10 = vsel %vm265_vm11, %v351_v62, %v262_v8 }
 0x2ca   :  { %v271_v11 = vsel %vm268_vm12, %v270_v9, %v266_v10 }
 0x2cb   :  { %v272_v12 = vmul.f32 %v347_v51, %v271_v11 }
 0x2cd   :  { %274 = vst.msk [vmem:[%s511_s7 + $0x8] sm:$0xff] %vm224_vm4, %v272_v12 }
 0x2ce   :  { %279 = vsyncpa [#allocation3], 1 }
 0x2cf   :  { %280 = vsyncpa [#allocation5], 1 }

</bundles_post_ra>
